<compile_context>
chip_gen: v6e
topology: v6e:2x2x1
jax: 0.10.0
libtpu: 0.0.40
codegen_flags: <defaults>
</compile_context>

<pallas_src>
import functools

import jax
import jax.numpy as jnp
from jax.experimental import pallas as pl
from jax.experimental.pallas import tpu as pltpu


def _round_up(x, m):
    return ((x + m - 1) // m) * m


def _takagi_sugeno_kernel(f_ref, x_ref, tw_ref, tb_ref, o_ref, *,
                          num_rules, num_outputs):
    # f_ref:  (TM, R)     normalized firing strengths (row tile)
    # x_ref:  (TM, I)     raw inputs (bias handled via tb_ref; no X_aug in HBM)
    # tw_ref: (I, R*O)    tw[i, r*O + o] = theta[r, i, o]   (VMEM-resident)
    # tb_ref: (1, R*O)    tb[0, r*O + o] = theta[r, I, o]   (VMEM-resident)
    # o_ref:  (TM, O)     output tile (natural layout, O == full output dim)
    f = f_ref[...].astype(jnp.float32)        # [TM, R]
    x = x_ref[...].astype(jnp.float32)        # [TM, I]

    # y[m, r*O + o] = sum_i x[m, i] * theta[r, i, o] + theta[r, I, o]
    y = jnp.dot(x, tw_ref[...], preferred_element_type=jnp.float32) + tb_ref[...]

    # out[m, o] = sum_r f[m, r] * y[m, r*O + o]   (static unroll over rules)
    o = num_outputs
    acc = f[:, 0:1] * y[:, 0:o]
    for r in range(1, num_rules):
        acc = acc + f[:, r:r + 1] * y[:, r * o:(r + 1) * o]

    o_ref[...] = acc.astype(o_ref.dtype)


def takagi_sugeno_forward(f, x, theta, *, tile_m=512):
    """f: [B, L, R], x: [B, L, I], theta: [R, I+1, O] -> [B, L, O]."""
    B, L, R = f.shape
    I = x.shape[-1]
    Ip1, O = theta.shape[1], theta.shape[2]
    assert Ip1 == I + 1, "theta must have num_inputs + 1 rows per rule (bias)"

    out_dtype = jnp.result_type(f.dtype, x.dtype, theta.dtype)

    # ---- wrapper-side layout plumbing (plain XLA glue) ----------------------
    M = B * L
    TM = min(tile_m, _round_up(M, 8))
    M_pad = _round_up(M, TM)

    f2 = f.reshape(M, R)
    x2 = x.reshape(M, I)
    if M_pad != M:
        f2 = jnp.pad(f2, ((0, M_pad - M), (0, 0)))
        x2 = jnp.pad(x2, ((0, M_pad - M), (0, 0)))

    # theta -> weight slab [I, R*O] and bias row [1, R*O] (tiny, VMEM-resident)
    tw = jnp.transpose(theta[:, :I, :], (1, 0, 2)).reshape(I, R * O)
    tw = tw.astype(jnp.float32)
    tb = theta[:, I, :].reshape(1, R * O).astype(jnp.float32)

    grid_m = M_pad // TM

    cost = pl.CostEstimate(
        flops=2 * M_pad * R * (I + 1) * O,
        transcendentals=0,
        bytes_accessed=(f2.size * f2.dtype.itemsize
                        + x2.size * x2.dtype.itemsize
                        + tw.size * 4 + tb.size * 4
                        + M_pad * O * jnp.dtype(out_dtype).itemsize),
    )

    out2 = pl.pallas_call(
        functools.partial(_takagi_sugeno_kernel, num_rules=R, num_outputs=O),
        out_shape=jax.ShapeDtypeStruct((M_pad, O), out_dtype),
        grid_spec=pltpu.PrefetchScalarGridSpec(
            num_scalar_prefetch=0,
            grid=(grid_m,),
            in_specs=[
                pl.BlockSpec((TM, R), lambda i: (i, 0)),
                pl.BlockSpec((TM, I), lambda i: (i, 0)),
                pl.BlockSpec((I, R * O), lambda i: (0, 0)),   # resident
                pl.BlockSpec((1, R * O), lambda i: (0, 0)),   # resident
            ],
            out_specs=pl.BlockSpec((TM, O), lambda i: (i, 0)),
        ),
        compiler_params=pltpu.CompilerParams(
            dimension_semantics=("parallel",),
        ),
        cost_estimate=cost,
    )(f2, x2, tw, tb)

    return out2[:M].reshape(B, L, O)


class ConsequentsPallas:
    """JAX/Pallas mirror of pyanfis Consequents (Takagi-Sugeno only)."""

    def __init__(self, num_inputs, num_outputs, parameters_update,
                 system_type: str = "Takagi-Sugeno", num_rules: int = 4,
                 key=None):
        if not (parameters_update == "forward" or parameters_update == "backward"):
            raise ValueError(
                f"Received {parameters_update} for parameters_update but it "
                "should be 'forward' or 'backward'."
            )
        if system_type != "Takagi-Sugeno":
            # TODO(synk): Tsukamoto / Lee consequents not implemented.
            raise NotImplementedError(system_type)
        self.parameters_update = parameters_update
        self.system_type = system_type
        self.num_inputs = num_inputs
        self.num_outputs = num_outputs
        self.num_rules = num_rules
        # Deterministic parameter init (synthetic, no checkpoint load).
        if key is None:
            key = jax.random.PRNGKey(42)
        self.theta = jax.random.normal(
            key, (num_rules, num_inputs + 1, num_outputs), jnp.float32
        ) * 0.1

    def __call__(self, f, X=None, Y=None):
        # Y is only used by the recursive-LSE training update ('forward' mode);
        # inference forward ignores it. TODO(synk): LSE state update not ported.
        return takagi_sugeno_forward(f, X, self.theta)


def _reference(f, x, theta):
    B, L, _ = f.shape
    xaug = jnp.concatenate([x, jnp.ones((B, L, 1), x.dtype)], axis=-1)
    # out[b,l,o] = sum_r sum_i f[b,l,r] * xaug[b,l,i] * theta[r,i,o]
    return jnp.einsum("blr,bli,rio->blo", f, xaug, theta)


if __name__ == "__main__":
    key = jax.random.PRNGKey(0)
    k1, k2, k3 = jax.random.split(key, 3)

    B, L = 2, 8                 # batches, lines (sequence length)
    num_inputs = 4
    num_outputs = 2
    num_rules = 4

    X = jax.random.normal(k1, (B, L, num_inputs), jnp.float32)
    f_raw = jax.random.uniform(k2, (B, L, num_rules), jnp.float32) + 1e-3
    f = f_raw / jnp.sum(f_raw, axis=-1, keepdims=True)   # normalized firing strengths

    model = ConsequentsPallas(num_inputs, num_outputs, "backward",
                              system_type="Takagi-Sugeno",
                              num_rules=num_rules, key=k3)

    out = model(f, X)
    out = jax.block_until_ready(out)

    ref = _reference(f, X, model.theta)
    assert out.shape == (B, L, num_outputs)
    assert jnp.allclose(out, ref, atol=1e-5, rtol=1e-5), "mismatch vs reference"

    # Exercise a larger, non-aligned shape to check the M-tiling / padding path.
    B2, L2 = 3, 700
    X2 = jax.random.normal(k1, (B2, L2, num_inputs), jnp.float32)
    f2_raw = jax.random.uniform(k2, (B2, L2, num_rules), jnp.float32) + 1e-3
    f2 = f2_raw / jnp.sum(f2_raw, axis=-1, keepdims=True)
    out2 = jax.block_until_ready(model(f2, X2))
    ref2 = _reference(f2, X2, model.theta)
    assert out2.shape == (B2, L2, num_outputs)
    assert jnp.allclose(out2, ref2, atol=1e-4, rtol=1e-4), "mismatch vs reference (big)"

    print("KERNEL_OK")
</pallas_src>

<mosaic_0001>
module attributes {stable_mosaic.version = 11 : i64} {
  func.func @_takagi_sugeno_kernel(%arg0: i32, %arg1: memref<16x4xf32, #tpu.memory_space<vmem>>, %arg2: memref<16x4xf32, #tpu.memory_space<vmem>>, %arg3: memref<4x8xf32, #tpu.memory_space<vmem>>, %arg4: memref<1x8xf32, #tpu.memory_space<vmem>>, %arg5: memref<16x2xf32, #tpu.memory_space<vmem>>) attributes {dimension_semantics = [#tpu.dimension_semantics<parallel>], iteration_bounds = array<i64: 1>, scalar_prefetch = 0 : i64, scratch_operands = 0 : i64, tpu.core_type = #tpu.core_type<tc>, window_params = [{transform_indices = @transform_0, window_bounds = array<i64: 16, 4>}, {transform_indices = @transform_1, window_bounds = array<i64: 16, 4>}, {pipeline_mode = #tpu.pipeline_mode<synchronous>, transform_indices = @transform_2, window_bounds = array<i64: 4, 8>}, {pipeline_mode = #tpu.pipeline_mode<synchronous>, transform_indices = @transform_3, window_bounds = array<i64: 1, 8>}, {transform_indices = @transform_4, window_bounds = array<i64: 16, 2>}]} {
    %c0 = arith.constant 0 : index
    %c0_0 = arith.constant 0 : index
    %0 = vector.load %arg1[%c0, %c0_0] : memref<16x4xf32, #tpu.memory_space<vmem>>, vector<16x4xf32>
    %c0_1 = arith.constant 0 : index
    %c0_2 = arith.constant 0 : index
    %1 = vector.load %arg2[%c0_1, %c0_2] : memref<16x4xf32, #tpu.memory_space<vmem>>, vector<16x4xf32>
    %c0_3 = arith.constant 0 : index
    %c0_4 = arith.constant 0 : index
    %2 = vector.load %arg3[%c0_3, %c0_4] : memref<4x8xf32, #tpu.memory_space<vmem>>, vector<4x8xf32>
    %cst = arith.constant dense<0.000000e+00> : vector<16x8xf32>
    %3 = tpu.matmul %1, %2, %cst {dimension_numbers = #tpu.dot_dimension_numbers<[1], [0], [0], [1], [0, 0, 1, 1], [], []>} : vector<16x4xf32>, vector<4x8xf32>, vector<16x8xf32> -> vector<16x8xf32>
    %c0_5 = arith.constant 0 : index
    %c0_6 = arith.constant 0 : index
    %4 = vector.load %arg4[%c0_5, %c0_6] : memref<1x8xf32, #tpu.memory_space<vmem>>, vector<1x8xf32>
    %5 = vector.broadcast %4 : vector<1x8xf32> to vector<16x8xf32>
    %6 = arith.addf %3, %5 : vector<16x8xf32>
    %7 = vector.extract_strided_slice %0 {offsets = [0, 0], sizes = [16, 1], strides = [1, 1]} : vector<16x4xf32> to vector<16x1xf32>
    %8 = vector.extract_strided_slice %6 {offsets = [0, 0], sizes = [16, 2], strides = [1, 1]} : vector<16x8xf32> to vector<16x2xf32>
    %9 = vector.broadcast %7 : vector<16x1xf32> to vector<16x2xf32>
    %10 = arith.mulf %9, %8 : vector<16x2xf32>
    %11 = vector.extract_strided_slice %0 {offsets = [0, 1], sizes = [16, 1], strides = [1, 1]} : vector<16x4xf32> to vector<16x1xf32>
    %12 = vector.extract_strided_slice %6 {offsets = [0, 2], sizes = [16, 2], strides = [1, 1]} : vector<16x8xf32> to vector<16x2xf32>
    %13 = vector.broadcast %11 : vector<16x1xf32> to vector<16x2xf32>
    %14 = arith.mulf %13, %12 : vector<16x2xf32>
    %15 = arith.addf %10, %14 : vector<16x2xf32>
    %16 = vector.extract_strided_slice %0 {offsets = [0, 2], sizes = [16, 1], strides = [1, 1]} : vector<16x4xf32> to vector<16x1xf32>
    %17 = vector.extract_strided_slice %6 {offsets = [0, 4], sizes = [16, 2], strides = [1, 1]} : vector<16x8xf32> to vector<16x2xf32>
    %18 = vector.broadcast %16 : vector<16x1xf32> to vector<16x2xf32>
    %19 = arith.mulf %18, %17 : vector<16x2xf32>
    %20 = arith.addf %15, %19 : vector<16x2xf32>
    %21 = vector.extract_strided_slice %0 {offsets = [0, 3], sizes = [16, 1], strides = [1, 1]} : vector<16x4xf32> to vector<16x1xf32>
    %22 = vector.extract_strided_slice %6 {offsets = [0, 6], sizes = [16, 2], strides = [1, 1]} : vector<16x8xf32> to vector<16x2xf32>
    %23 = vector.broadcast %21 : vector<16x1xf32> to vector<16x2xf32>
    %24 = arith.mulf %23, %22 : vector<16x2xf32>
    %25 = arith.addf %20, %24 : vector<16x2xf32>
    %c0_7 = arith.constant 0 : index
    %c0_8 = arith.constant 0 : index
    %26 = vector.load %arg5[%c0_7, %c0_8] : memref<16x2xf32, #tpu.memory_space<vmem>>, vector<16x2xf32>
    tpu.vector_store %arg5[%c0_7, %c0_8], %25 {strides = array<i32>} : memref<16x2xf32, #tpu.memory_space<vmem>>, vector<16x2xf32>,
    return
  }
  func.func @transform_0(%arg0: i32) -> (i32, i32) {
    %c0_i32 = arith.constant 0 : i32
    %c0_i32_0 = arith.constant 0 : i32
    return %arg0, %c0_i32 : i32, i32
  }
  func.func @transform_1(%arg0: i32) -> (i32, i32) {
    %c0_i32 = arith.constant 0 : i32
    %c0_i32_0 = arith.constant 0 : i32
    return %arg0, %c0_i32 : i32, i32
  }
  func.func @transform_2(%arg0: i32) -> (i32, i32) {
    %c0_i32 = arith.constant 0 : i32
    %c0_i32_0 = arith.constant 0 : i32
    %c0_i32_1 = arith.constant 0 : i32
    return %c0_i32, %c0_i32_0 : i32, i32
  }
  func.func @transform_3(%arg0: i32) -> (i32, i32) {
    %c0_i32 = arith.constant 0 : i32
    %c0_i32_0 = arith.constant 0 : i32
    %c0_i32_1 = arith.constant 0 : i32
    return %c0_i32, %c0_i32_0 : i32, i32
  }
  func.func @transform_4(%arg0: i32) -> (i32, i32) {
    %c0_i32 = arith.constant 0 : i32
    %c0_i32_0 = arith.constant 0 : i32
    return %arg0, %c0_i32 : i32, i32
  }
}

</mosaic_0001>

<bundles_post_ra>
// kernel: tpu_custom_call.1
= control target key start
LH: loop header
LB: loop body
LE: loop exit
PB: predicated region body
PF: predicated region fallthrough
CT: control target
= control target key end

     0   :  { %vm36_vm0 = vcmask 1043456   ;;  %vm29_vm1 = vcmask 31744   ;;  %v220_v3 = vmov 1   ;;  %v221_v4 = vmov 2   ;;  %s225_s25 = smov 124   ;;  %s226_s26 = smov 122   ;;  %s276_s2 = inlined_call_operand.vmem [shape: f32[4,8], index: 2, kind: input, shape index: {}]   ;;  %s277_s1 = inlined_call_operand.vmem [shape: f32[16,4], index: 1, kind: input, shape index: {}]   ;;  %s278_s0 = inlined_call_operand.vmem [shape: f32[16,4], index: 0, kind: input, shape index: {}]   ;;  %s279_s3 = inlined_call_operand.vmem [shape: f32[1,8], index: 3, kind: input, shape index: {}]   ;;  %s280_s4 = inlined_call_operand.vmem [shape: f32[16,2], index: 4, kind: output, shape index: {}]  }
   0x1   :  { %v21_v0 = vld [vmem:[%s276_s2] sm:$0xf]  ;;  %v20_v2 = vld [vmem:[%s277_s1 + $0x8] sm:$0xff]  ;;  %213 = vset.pattern.permute.xlu0 %v220_v3  ;;  %214 = vset.pattern.permute.xlu1 %v221_v4  ;;  %v222_v7 = vmov 3   ;;  %v223_v8 = vmov 0   ;;  %vm187_vm2 = vcmask 15360  }
   0x2   :  { %v19_v1 = vld [vmem:[%s277_s1] sm:$0xff]  ;;  %201 = vmatprep.subr.msk.mxu0 %vm36_vm0, %v21_v0  ;;  %v18_v6 = vld [vmem:[%s278_s0 + $0x8] sm:$0xff] }
   0x3   :  { %203 = vmatprep.mubr.msk.f32.mxu0 %vm29_vm1, %v19_v1  ;;  %v17_v5 = vld [vmem:[%s278_s0] sm:$0xff]  ;;  %202 = vmatpush3.msk.msra.mxu0 %vm36_vm0, %v21_v0  ;;  %s224_s0 = smov 126  }
   0x4   :  { %128 = vperm.xlu0 %213, %v17_v5   ;;  %204 = vmatmul.mubr.msk.f32.vlgmr.msra.gmra.mxu0 %vm29_vm1, %v20_v2  ;;  %v194_v10 = vld [vmem:[%s279_s3] ss:$0 sm:$0xff] }
   0x5   :  { %148 = vperm.xlu1 %214, %v17_v5  }
   0x8   :  { %132 = vperm.xlu0 %213, %v18_v6  }
   0x9   :  { %152 = vperm.xlu1 %214, %v18_v6  }
   0xc   :  { %215 = vset.pattern.permute.xlu0 %v222_v7 }
   0xd   :  { %168 = vperm.xlu0 %215, %v17_v5   ;;  %216 = vset.pattern.permute.xlu1 %v222_v7 }
   0xe   :  { %172 = vperm.xlu1 %216, %v18_v6  }
  0x11   :  { %218 = vset.pattern.permute.xlu0 %v223_v8 }
  0x12   :  { %122 = vperm.xlu0 %218, %v18_v6   ;;  %217 = vset.pattern.permute.xlu1 %v223_v8 }
  0x13   :  { %117 = vperm.xlu1 %217, %v17_v5  }
  0x16   :  { %219 = vset.pattern.permute.xlu0 %v222_v7 }
  0x7f   :  { %v129_v9 = vpop.permute.xlu0 %128 }
  0x80   :  { %v149_v11 = vpop.permute.xlu1 %148 }
  0x83   :  { %v133_v14 = vpop.permute.xlu0 %132 }
  0x84   :  { %v153_v19 = vpop.permute.xlu1 %152 }
  0x88   :  { %v169_v21 = vpop.permute.xlu0 %168 }
  0x89   :  { %v173_v24 = vpop.permute.xlu1 %172 }
  0x8d   :  { %v123_v28 = vpop.permute.xlu0 %122 }
  0x8e   :  { %v118_v26 = vpop.permute.xlu1 %117 }
  0xc4   :  { %v205_v12 = vpop.f32.mrf.mxu0 }
  0xc5   :  { %v112_v13 = vadd.f32 %v205_v12, %v194_v10 }
  0xc6   :  { %v106_v15 = vpop.f32.mrf.mxu0 }
  0xc7   :  { %v107_v16 = vadd.f32 %v194_v10, %v106_v15  ;;  %v136_v17 = vmul.f32 %v133_v14, %v112_v13  ;;  %v156_v20 = vmul.f32 %v153_v19, %v112_v13  ;;  %v176_v25 = vmul.f32 %v173_v24, %v112_v13 }
  0xc8   :  { %v126_v31 = vmul.f32 %v123_v28, %v112_v13 }
  0xc9   :  { %141 = vrot.lane.b32.xlu1 %v136_v17, %s224_s0  ;;  %v155_v18 = vmul.f32 %v149_v11, %v107_v16  ;;  %v175_v22 = vmul.f32 %v169_v21, %v107_v16  ;;  %v135_v23 = vmul.f32 %v129_v9, %v107_v16  ;;  %v125_v32 = vmul.f32 %v118_v26, %v107_v16 }
  0xcb   :  { %159 = vrot.lane.b32.xlu0 %v155_v18, %s225_s25 }
  0xcd   :  { %161 = vrot.lane.b32.xlu1 %v156_v20, %s225_s25 }
  0xcf   :  { %179 = vrot.lane.b32.xlu0 %v175_v22, %s226_s26 }
  0xd1   :  { %139 = vrot.lane.b32.xlu1 %v135_v23, %s224_s0 }
  0xd5   :  { %181 = vrot.lane.b32.xlu1 %v176_v25, %s226_s26 }
 0x13b   :  { %v142_v27 = vpop.permute.xlu1 %141 }
 0x13c   :  { %v146_v34 = vadd.f32 %v142_v27, %v126_v31 }
 0x13d   :  { %v160_v30 = vpop.permute.xlu0 %159 }
 0x13f   :  { %v162_v29 = vpop.permute.xlu1 %161 }
 0x140   :  { %v166_v36 = vadd.f32 %v162_v29, %v146_v34 }
 0x141   :  { %v180_v38 = vpop.permute.xlu0 %179 }
 0x143   :  { %v140_v33 = vpop.permute.xlu1 %139 }
 0x144   :  { %v145_v35 = vadd.f32 %v140_v33, %v125_v32 }
 0x146   :  { %v165_v37 = vadd.f32 %v160_v30, %v145_v35 }
 0x147   :  { %v182_v39 = vpop.permute.xlu1 %181 }
 0x148   :  { %v185_v40 = vadd.f32 %v180_v38, %v165_v37  ;;  %v186_v41 = vadd.f32 %v182_v39, %v166_v36 }
 0x14a   :  { %188 = vst.msk [vmem:[%s280_s4] sm:$0xff] %vm187_vm2, %v185_v40  ;;  %189 = vst.msk [vmem:[%s280_s4 + $0x8] sm:$0xff] %vm187_vm2, %v186_v41 }

</bundles_post_ra>
